<compile_context>
chip_gen: v6e
topology: v6e:2x2x1
jax: 0.10.0
libtpu: 0.0.40
codegen_flags: <defaults>
</compile_context>

<pallas_src>
import jax
import jax.numpy as jnp
from jax.experimental import pallas as pl
from jax.experimental.pallas import tpu as pltpu

_CLAMP_LO = 1e-12
_CLAMP_HI = 1e12


def _pick_tb(batch_size):
    """Batch-tile size: small multiple of 8 that divides B (caps DMA-sem count)."""
    for tb in (32, 16, 8):
        if batch_size % tb == 0:
            return tb
    return batch_size  # block == full dim, always layout-legal


def _make_kernel(B, C, D, tb):
    # Contribution of the B*(C-1) masked-out zeros that PyTorch clamps to 1e-12,
    # already divided by B.
    clamp_const = (C - 1) * _CLAMP_LO

    def kernel(labels_ref, x_ref, centers_hbm, out_ref, cg_ref, sem_ref):
        step = pl.program_id(0)
        nsteps = pl.num_programs(0)

        # ---- gather the tb true-class center rows for this batch tile -------
        # (manual DMA gather driven by scalar-prefetched labels in SMEM;
        #  scalar reads all happen before any .wait())
        base = step * tb
        copies = []
        for r in range(tb):
            idx = labels_ref[base + r]
            cp = pltpu.make_async_copy(
                centers_hbm.at[pl.ds(idx, 1), :],   # (1, D) row in HBM
                cg_ref.at[pl.ds(r, 1), :],          # (1, D) row in VMEM scratch
                sem_ref.at[r],
            )
            cp.start()
            copies.append(cp)
        for cp in copies:
            cp.wait()

        # ---- accumulator init (output block is resident across the grid) ----
        @pl.when(step == 0)
        def _():
            out_ref[...] = jnp.zeros_like(out_ref)

        # ---- per-row squared distance to the true-class center --------------
        # Same quadratic form as the PyTorch addmm_ path, restricted to the one
        # selected column per row (no (B,C) distmat, no mask multiply).
        x = x_ref[...]    # (tb, D) f32
        cg = cg_ref[...]  # (tb, D) f32
        x_sq = jnp.sum(x * x, axis=1, keepdims=True)     # (tb, 1)
        c_sq = jnp.sum(cg * cg, axis=1, keepdims=True)   # (tb, 1)
        cross = jnp.sum(x * cg, axis=1, keepdims=True)   # (tb, 1)
        d = x_sq + c_sq - 2.0 * cross                    # (tb, 1)

        partial = jnp.sum(jnp.clip(d, _CLAMP_LO, _CLAMP_HI), keepdims=True)  # (1,1)
        out_ref[...] = out_ref[...] + partial

        # ---- finalize: /B plus the analytic clamped-zeros constant ----------
        @pl.when(step == nsteps - 1)
        def _():
            out_ref[...] = out_ref[...] / jnp.float32(B) + jnp.float32(clamp_const)

    return kernel


def center_loss(x, labels, centers):
    """x: (B, D) f32, labels: (B,) int, centers: (C, D) f32 -> scalar f32."""
    x = x.astype(jnp.float32)
    centers = centers.astype(jnp.float32)
    labels = labels.astype(jnp.int32)
    B, D = x.shape
    C = centers.shape[0]

    tb = _pick_tb(B)
    nsteps = B // tb

    kernel = _make_kernel(B, C, D, tb)

    grid_spec = pltpu.PrefetchScalarGridSpec(
        num_scalar_prefetch=1,            # labels -> SMEM (drives the DMA gather)
        grid=(nsteps,),
        in_specs=[
            # x: auto-pipelined (tb, D) batch tiles in VMEM.
            pl.BlockSpec((tb, D), lambda i, labels: (i, 0)),
            # centers: left in HBM; only the B selected rows are DMA'd.
            pl.BlockSpec(memory_space=pl.ANY),
        ],
        # Resident (1,1) accumulator/output block across the reduction axis.
        out_specs=pl.BlockSpec((1, 1), lambda i, labels: (0, 0)),
        scratch_shapes=[
            pltpu.VMEM((tb, D), jnp.float32),   # gathered true-class centers
            pltpu.SemaphoreType.DMA((tb,)),     # one DMA sem per gathered row
        ],
    )

    cost = pl.CostEstimate(
        flops=8 * B * D,            # squares, cross term, combines, clamp/sum
        transcendentals=0,
        bytes_accessed=2 * B * D * 4 + B * 4 + 4,   # x + gathered centers + labels + out
    )

    out = pl.pallas_call(
        kernel,
        out_shape=jax.ShapeDtypeStruct((1, 1), jnp.float32),
        grid_spec=grid_spec,
        compiler_params=pltpu.CompilerParams(
            # batch axis carries the running-sum output block -> reduction axis
            dimension_semantics=("arbitrary",),
            vmem_limit_bytes=32 * 1024 * 1024,  # safe on v5e/v6e/v7x
        ),
        cost_estimate=cost,
    )(labels, x, centers)
    return out[0, 0]


def center_loss_ref(x, labels, centers):
    """Pure-JAX reference mirroring the PyTorch forward (full distmat + mask)."""
    B = x.shape[0]
    C = centers.shape[0]
    distmat = (jnp.sum(x ** 2, axis=1, keepdims=True)
               + jnp.sum(centers ** 2, axis=1, keepdims=True).T
               - 2.0 * x @ centers.T)
    mask = (labels[:, None] == jnp.arange(C)[None, :]).astype(jnp.float32)
    dist = distmat * mask
    return jnp.sum(jnp.clip(dist, _CLAMP_LO, _CLAMP_HI)) / B


if __name__ == "__main__":
    num_classes = 10
    feat_dim = 32
    batch_size = 8

    key = jax.random.PRNGKey(0)
    k_centers, k_x, k_lab = jax.random.split(key, 3)

    # deterministic "parameter" init (nn.Parameter(torch.randn(C, D)))
    centers = jax.random.normal(k_centers, (num_classes, feat_dim), dtype=jnp.float32)
    x = jax.random.normal(k_x, (batch_size, feat_dim), dtype=jnp.float32)
    labels = jax.random.randint(k_lab, (batch_size,), 0, num_classes, dtype=jnp.int32)

    loss = center_loss(x, labels, centers)
    jax.block_until_ready(loss)

    ref = center_loss_ref(x, labels, centers)
    assert jnp.allclose(loss, ref, rtol=1e-5, atol=1e-5), (loss, ref)

    print("KERNEL_OK")
</pallas_src>

<mosaic_0001>
module attributes {stable_mosaic.version = 11 : i64} {
  func.func @kernel(%arg0: i32, %arg1: memref<8xi32, #tpu.memory_space<smem>>, %arg2: memref<8x32xf32, #tpu.memory_space<vmem>>, %arg3: memref<10x32xf32, #tpu.memory_space<any>>, %arg4: memref<1x1xf32, #tpu.memory_space<vmem>>, %arg5: memref<8x32xf32, #tpu.memory_space<vmem>>, %arg6: memref<8x!tpu.dma_semaphore, #tpu.memory_space<semaphore_mem>>) attributes {dimension_semantics = [#tpu.dimension_semantics<arbitrary>], iteration_bounds = array<i64: 1>, scalar_prefetch = 1 : i64, scratch_operands = 2 : i64, tpu.core_type = #tpu.core_type<tc>, window_params = [{transform_indices = @transform_0, window_bounds = array<i64: 8, 32>}, {}, {pipeline_mode = #tpu.pipeline_mode<synchronous>, transform_indices = @transform_2, window_bounds = array<i64: 1, 1>}]} {
    %c8_i32 = arith.constant 8 : i32
    %0 = arith.muli %arg0, %c8_i32 : i32
    %c0_i32 = arith.constant 0 : i32
    %1 = arith.addi %0, %c0_i32 : i32
    %2 = arith.index_cast %1 : i32 to index
    %3 = memref.load %arg1[%2] : memref<8xi32, #tpu.memory_space<smem>>
    %c0_i32_0 = arith.constant 0 : i32
    %c0_i32_1 = arith.constant 0 : i32
    %4 = tpu.memref_slice %arg3[%3, %c0_i32_1] : memref<10x32xf32, #tpu.memory_space<any>> -> memref<1x32xf32, #tpu.memory_space<any>>
    %c0_i32_2 = arith.constant 0 : i32
    %c0_i32_3 = arith.constant 0 : i32
    %5 = tpu.memref_slice %arg5[%c0_i32_2, %c0_i32_3] : memref<8x32xf32, #tpu.memory_space<vmem>> -> memref<1x32xf32, #tpu.memory_space<vmem>>
    %6 = tpu.memref_slice %arg6[%c0_i32_0] : memref<8x!tpu.dma_semaphore, #tpu.memory_space<semaphore_mem>> -> memref<1x!tpu.dma_semaphore, #tpu.memory_space<semaphore_mem>>
    %7 = tpu.memref_squeeze %6 : memref<1x!tpu.dma_semaphore, #tpu.memory_space<semaphore_mem>> -> memref<!tpu.dma_semaphore, #tpu.memory_space<semaphore_mem>>
    tpu.enqueue_dma source(%4 : memref<1x32xf32, #tpu.memory_space<any>>) target(%5 : memref<1x32xf32, #tpu.memory_space<vmem>>) target_semaphore(%7 : memref<!tpu.dma_semaphore, #tpu.memory_space<semaphore_mem>>)
    %c1_i32 = arith.constant 1 : i32
    %8 = arith.addi %0, %c1_i32 : i32
    %9 = arith.index_cast %8 : i32 to index
    %10 = memref.load %arg1[%9] : memref<8xi32, #tpu.memory_space<smem>>
    %c1_i32_4 = arith.constant 1 : i32
    %c0_i32_5 = arith.constant 0 : i32
    %11 = tpu.memref_slice %arg3[%10, %c0_i32_5] : memref<10x32xf32, #tpu.memory_space<any>> -> memref<1x32xf32, #tpu.memory_space<any>>
    %c1_i32_6 = arith.constant 1 : i32
    %c0_i32_7 = arith.constant 0 : i32
    %12 = tpu.memref_slice %arg5[%c1_i32_6, %c0_i32_7] : memref<8x32xf32, #tpu.memory_space<vmem>> -> memref<1x32xf32, #tpu.memory_space<vmem>>
    %13 = tpu.memref_slice %arg6[%c1_i32_4] : memref<8x!tpu.dma_semaphore, #tpu.memory_space<semaphore_mem>> -> memref<1x!tpu.dma_semaphore, #tpu.memory_space<semaphore_mem>>
    %14 = tpu.memref_squeeze %13 : memref<1x!tpu.dma_semaphore, #tpu.memory_space<semaphore_mem>> -> memref<!tpu.dma_semaphore, #tpu.memory_space<semaphore_mem>>
    tpu.enqueue_dma source(%11 : memref<1x32xf32, #tpu.memory_space<any>>) target(%12 : memref<1x32xf32, #tpu.memory_space<vmem>>) target_semaphore(%14 : memref<!tpu.dma_semaphore, #tpu.memory_space<semaphore_mem>>)
    %c2_i32 = arith.constant 2 : i32
    %15 = arith.addi %0, %c2_i32 : i32
    %16 = arith.index_cast %15 : i32 to index
    %17 = memref.load %arg1[%16] : memref<8xi32, #tpu.memory_space<smem>>
    %c2_i32_8 = arith.constant 2 : i32
    %c0_i32_9 = arith.constant 0 : i32
    %18 = tpu.memref_slice %arg3[%17, %c0_i32_9] : memref<10x32xf32, #tpu.memory_space<any>> -> memref<1x32xf32, #tpu.memory_space<any>>
    %c2_i32_10 = arith.constant 2 : i32
    %c0_i32_11 = arith.constant 0 : i32
    %19 = tpu.memref_slice %arg5[%c2_i32_10, %c0_i32_11] : memref<8x32xf32, #tpu.memory_space<vmem>> -> memref<1x32xf32, #tpu.memory_space<vmem>>
    %20 = tpu.memref_slice %arg6[%c2_i32_8] : memref<8x!tpu.dma_semaphore, #tpu.memory_space<semaphore_mem>> -> memref<1x!tpu.dma_semaphore, #tpu.memory_space<semaphore_mem>>
    %21 = tpu.memref_squeeze %20 : memref<1x!tpu.dma_semaphore, #tpu.memory_space<semaphore_mem>> -> memref<!tpu.dma_semaphore, #tpu.memory_space<semaphore_mem>>
    tpu.enqueue_dma source(%18 : memref<1x32xf32, #tpu.memory_space<any>>) target(%19 : memref<1x32xf32, #tpu.memory_space<vmem>>) target_semaphore(%21 : memref<!tpu.dma_semaphore, #tpu.memory_space<semaphore_mem>>)
    %c3_i32 = arith.constant 3 : i32
    %22 = arith.addi %0, %c3_i32 : i32
    %23 = arith.index_cast %22 : i32 to index
    %24 = memref.load %arg1[%23] : memref<8xi32, #tpu.memory_space<smem>>
    %c3_i32_12 = arith.constant 3 : i32
    %c0_i32_13 = arith.constant 0 : i32
    %25 = tpu.memref_slice %arg3[%24, %c0_i32_13] : memref<10x32xf32, #tpu.memory_space<any>> -> memref<1x32xf32, #tpu.memory_space<any>>
    %c3_i32_14 = arith.constant 3 : i32
    %c0_i32_15 = arith.constant 0 : i32
    %26 = tpu.memref_slice %arg5[%c3_i32_14, %c0_i32_15] : memref<8x32xf32, #tpu.memory_space<vmem>> -> memref<1x32xf32, #tpu.memory_space<vmem>>
    %27 = tpu.memref_slice %arg6[%c3_i32_12] : memref<8x!tpu.dma_semaphore, #tpu.memory_space<semaphore_mem>> -> memref<1x!tpu.dma_semaphore, #tpu.memory_space<semaphore_mem>>
    %28 = tpu.memref_squeeze %27 : memref<1x!tpu.dma_semaphore, #tpu.memory_space<semaphore_mem>> -> memref<!tpu.dma_semaphore, #tpu.memory_space<semaphore_mem>>
    tpu.enqueue_dma source(%25 : memref<1x32xf32, #tpu.memory_space<any>>) target(%26 : memref<1x32xf32, #tpu.memory_space<vmem>>) target_semaphore(%28 : memref<!tpu.dma_semaphore, #tpu.memory_space<semaphore_mem>>)
    %c4_i32 = arith.constant 4 : i32
    %29 = arith.addi %0, %c4_i32 : i32
    %30 = arith.index_cast %29 : i32 to index
    %31 = memref.load %arg1[%30] : memref<8xi32, #tpu.memory_space<smem>>
    %c4_i32_16 = arith.constant 4 : i32
    %c0_i32_17 = arith.constant 0 : i32
    %32 = tpu.memref_slice %arg3[%31, %c0_i32_17] : memref<10x32xf32, #tpu.memory_space<any>> -> memref<1x32xf32, #tpu.memory_space<any>>
    %c4_i32_18 = arith.constant 4 : i32
    %c0_i32_19 = arith.constant 0 : i32
    %33 = tpu.memref_slice %arg5[%c4_i32_18, %c0_i32_19] : memref<8x32xf32, #tpu.memory_space<vmem>> -> memref<1x32xf32, #tpu.memory_space<vmem>>
    %34 = tpu.memref_slice %arg6[%c4_i32_16] : memref<8x!tpu.dma_semaphore, #tpu.memory_space<semaphore_mem>> -> memref<1x!tpu.dma_semaphore, #tpu.memory_space<semaphore_mem>>
    %35 = tpu.memref_squeeze %34 : memref<1x!tpu.dma_semaphore, #tpu.memory_space<semaphore_mem>> -> memref<!tpu.dma_semaphore, #tpu.memory_space<semaphore_mem>>
    tpu.enqueue_dma source(%32 : memref<1x32xf32, #tpu.memory_space<any>>) target(%33 : memref<1x32xf32, #tpu.memory_space<vmem>>) target_semaphore(%35 : memref<!tpu.dma_semaphore, #tpu.memory_space<semaphore_mem>>)
    %c5_i32 = arith.constant 5 : i32
    %36 = arith.addi %0, %c5_i32 : i32
    %37 = arith.index_cast %36 : i32 to index
    %38 = memref.load %arg1[%37] : memref<8xi32, #tpu.memory_space<smem>>
    %c5_i32_20 = arith.constant 5 : i32
    %c0_i32_21 = arith.constant 0 : i32
    %39 = tpu.memref_slice %arg3[%38, %c0_i32_21] : memref<10x32xf32, #tpu.memory_space<any>> -> memref<1x32xf32, #tpu.memory_space<any>>
    %c5_i32_22 = arith.constant 5 : i32
    %c0_i32_23 = arith.constant 0 : i32
    %40 = tpu.memref_slice %arg5[%c5_i32_22, %c0_i32_23] : memref<8x32xf32, #tpu.memory_space<vmem>> -> memref<1x32xf32, #tpu.memory_space<vmem>>
    %41 = tpu.memref_slice %arg6[%c5_i32_20] : memref<8x!tpu.dma_semaphore, #tpu.memory_space<semaphore_mem>> -> memref<1x!tpu.dma_semaphore, #tpu.memory_space<semaphore_mem>>
    %42 = tpu.memref_squeeze %41 : memref<1x!tpu.dma_semaphore, #tpu.memory_space<semaphore_mem>> -> memref<!tpu.dma_semaphore, #tpu.memory_space<semaphore_mem>>
    tpu.enqueue_dma source(%39 : memref<1x32xf32, #tpu.memory_space<any>>) target(%40 : memref<1x32xf32, #tpu.memory_space<vmem>>) target_semaphore(%42 : memref<!tpu.dma_semaphore, #tpu.memory_space<semaphore_mem>>)
    %c6_i32 = arith.constant 6 : i32
    %43 = arith.addi %0, %c6_i32 : i32
    %44 = arith.index_cast %43 : i32 to index
    %45 = memref.load %arg1[%44] : memref<8xi32, #tpu.memory_space<smem>>
    %c6_i32_24 = arith.constant 6 : i32
    %c0_i32_25 = arith.constant 0 : i32
    %46 = tpu.memref_slice %arg3[%45, %c0_i32_25] : memref<10x32xf32, #tpu.memory_space<any>> -> memref<1x32xf32, #tpu.memory_space<any>>
    %c6_i32_26 = arith.constant 6 : i32
    %c0_i32_27 = arith.constant 0 : i32
    %47 = tpu.memref_slice %arg5[%c6_i32_26, %c0_i32_27] : memref<8x32xf32, #tpu.memory_space<vmem>> -> memref<1x32xf32, #tpu.memory_space<vmem>>
    %48 = tpu.memref_slice %arg6[%c6_i32_24] : memref<8x!tpu.dma_semaphore, #tpu.memory_space<semaphore_mem>> -> memref<1x!tpu.dma_semaphore, #tpu.memory_space<semaphore_mem>>
    %49 = tpu.memref_squeeze %48 : memref<1x!tpu.dma_semaphore, #tpu.memory_space<semaphore_mem>> -> memref<!tpu.dma_semaphore, #tpu.memory_space<semaphore_mem>>
    tpu.enqueue_dma source(%46 : memref<1x32xf32, #tpu.memory_space<any>>) target(%47 : memref<1x32xf32, #tpu.memory_space<vmem>>) target_semaphore(%49 : memref<!tpu.dma_semaphore, #tpu.memory_space<semaphore_mem>>)
    %c7_i32 = arith.constant 7 : i32
    %50 = arith.addi %0, %c7_i32 : i32
    %51 = arith.index_cast %50 : i32 to index
    %52 = memref.load %arg1[%51] : memref<8xi32, #tpu.memory_space<smem>>
    %c7_i32_28 = arith.constant 7 : i32
    %c0_i32_29 = arith.constant 0 : i32
    %53 = tpu.memref_slice %arg3[%52, %c0_i32_29] : memref<10x32xf32, #tpu.memory_space<any>> -> memref<1x32xf32, #tpu.memory_space<any>>
    %c7_i32_30 = arith.constant 7 : i32
    %c0_i32_31 = arith.constant 0 : i32
    %54 = tpu.memref_slice %arg5[%c7_i32_30, %c0_i32_31] : memref<8x32xf32, #tpu.memory_space<vmem>> -> memref<1x32xf32, #tpu.memory_space<vmem>>
    %55 = tpu.memref_slice %arg6[%c7_i32_28] : memref<8x!tpu.dma_semaphore, #tpu.memory_space<semaphore_mem>> -> memref<1x!tpu.dma_semaphore, #tpu.memory_space<semaphore_mem>>
    %56 = tpu.memref_squeeze %55 : memref<1x!tpu.dma_semaphore, #tpu.memory_space<semaphore_mem>> -> memref<!tpu.dma_semaphore, #tpu.memory_space<semaphore_mem>>
    tpu.enqueue_dma source(%53 : memref<1x32xf32, #tpu.memory_space<any>>) target(%54 : memref<1x32xf32, #tpu.memory_space<vmem>>) target_semaphore(%56 : memref<!tpu.dma_semaphore, #tpu.memory_space<semaphore_mem>>)
    %c0_i32_32 = arith.constant 0 : i32
    %c0_i32_33 = arith.constant 0 : i32
    %57 = tpu.memref_slice %arg3[%3, %c0_i32_33] : memref<10x32xf32, #tpu.memory_space<any>> -> memref<1x32xf32, #tpu.memory_space<any>>
    %c0_i32_34 = arith.constant 0 : i32
    %c0_i32_35 = arith.constant 0 : i32
    %58 = tpu.memref_slice %arg5[%c0_i32_34, %c0_i32_35] : memref<8x32xf32, #tpu.memory_space<vmem>> -> memref<1x32xf32, #tpu.memory_space<vmem>>
    %59 = tpu.memref_slice %arg6[%c0_i32_32] : memref<8x!tpu.dma_semaphore, #tpu.memory_space<semaphore_mem>> -> memref<1x!tpu.dma_semaphore, #tpu.memory_space<semaphore_mem>>
    %60 = tpu.memref_squeeze %59 : memref<1x!tpu.dma_semaphore, #tpu.memory_space<semaphore_mem>> -> memref<!tpu.dma_semaphore, #tpu.memory_space<semaphore_mem>>
    tpu.wait_dma2 semaphore(%60 : memref<!tpu.dma_semaphore, #tpu.memory_space<semaphore_mem>>) src(%57 : memref<1x32xf32, #tpu.memory_space<any>>) dst(%58 : memref<1x32xf32, #tpu.memory_space<vmem>>)
    %c1_i32_36 = arith.constant 1 : i32
    %c0_i32_37 = arith.constant 0 : i32
    %61 = tpu.memref_slice %arg3[%10, %c0_i32_37] : memref<10x32xf32, #tpu.memory_space<any>> -> memref<1x32xf32, #tpu.memory_space<any>>
    %c1_i32_38 = arith.constant 1 : i32
    %c0_i32_39 = arith.constant 0 : i32
    %62 = tpu.memref_slice %arg5[%c1_i32_38, %c0_i32_39] : memref<8x32xf32, #tpu.memory_space<vmem>> -> memref<1x32xf32, #tpu.memory_space<vmem>>
    %63 = tpu.memref_slice %arg6[%c1_i32_36] : memref<8x!tpu.dma_semaphore, #tpu.memory_space<semaphore_mem>> -> memref<1x!tpu.dma_semaphore, #tpu.memory_space<semaphore_mem>>
    %64 = tpu.memref_squeeze %63 : memref<1x!tpu.dma_semaphore, #tpu.memory_space<semaphore_mem>> -> memref<!tpu.dma_semaphore, #tpu.memory_space<semaphore_mem>>
    tpu.wait_dma2 semaphore(%64 : memref<!tpu.dma_semaphore, #tpu.memory_space<semaphore_mem>>) src(%61 : memref<1x32xf32, #tpu.memory_space<any>>) dst(%62 : memref<1x32xf32, #tpu.memory_space<vmem>>)
    %c2_i32_40 = arith.constant 2 : i32
    %c0_i32_41 = arith.constant 0 : i32
    %65 = tpu.memref_slice %arg3[%17, %c0_i32_41] : memref<10x32xf32, #tpu.memory_space<any>> -> memref<1x32xf32, #tpu.memory_space<any>>
    %c2_i32_42 = arith.constant 2 : i32
    %c0_i32_43 = arith.constant 0 : i32
    %66 = tpu.memref_slice %arg5[%c2_i32_42, %c0_i32_43] : memref<8x32xf32, #tpu.memory_space<vmem>> -> memref<1x32xf32, #tpu.memory_space<vmem>>
    %67 = tpu.memref_slice %arg6[%c2_i32_40] : memref<8x!tpu.dma_semaphore, #tpu.memory_space<semaphore_mem>> -> memref<1x!tpu.dma_semaphore, #tpu.memory_space<semaphore_mem>>
    %68 = tpu.memref_squeeze %67 : memref<1x!tpu.dma_semaphore, #tpu.memory_space<semaphore_mem>> -> memref<!tpu.dma_semaphore, #tpu.memory_space<semaphore_mem>>
    tpu.wait_dma2 semaphore(%68 : memref<!tpu.dma_semaphore, #tpu.memory_space<semaphore_mem>>) src(%65 : memref<1x32xf32, #tpu.memory_space<any>>) dst(%66 : memref<1x32xf32, #tpu.memory_space<vmem>>)
    %c3_i32_44 = arith.constant 3 : i32
    %c0_i32_45 = arith.constant 0 : i32
    %69 = tpu.memref_slice %arg3[%24, %c0_i32_45] : memref<10x32xf32, #tpu.memory_space<any>> -> memref<1x32xf32, #tpu.memory_space<any>>
    %c3_i32_46 = arith.constant 3 : i32
    %c0_i32_47 = arith.constant 0 : i32
    %70 = tpu.memref_slice %arg5[%c3_i32_46, %c0_i32_47] : memref<8x32xf32, #tpu.memory_space<vmem>> -> memref<1x32xf32, #tpu.memory_space<vmem>>
    %71 = tpu.memref_slice %arg6[%c3_i32_44] : memref<8x!tpu.dma_semaphore, #tpu.memory_space<semaphore_mem>> -> memref<1x!tpu.dma_semaphore, #tpu.memory_space<semaphore_mem>>
    %72 = tpu.memref_squeeze %71 : memref<1x!tpu.dma_semaphore, #tpu.memory_space<semaphore_mem>> -> memref<!tpu.dma_semaphore, #tpu.memory_space<semaphore_mem>>
    tpu.wait_dma2 semaphore(%72 : memref<!tpu.dma_semaphore, #tpu.memory_space<semaphore_mem>>) src(%69 : memref<1x32xf32, #tpu.memory_space<any>>) dst(%70 : memref<1x32xf32, #tpu.memory_space<vmem>>)
    %c4_i32_48 = arith.constant 4 : i32
    %c0_i32_49 = arith.constant 0 : i32
    %73 = tpu.memref_slice %arg3[%31, %c0_i32_49] : memref<10x32xf32, #tpu.memory_space<any>> -> memref<1x32xf32, #tpu.memory_space<any>>
    %c4_i32_50 = arith.constant 4 : i32
    %c0_i32_51 = arith.constant 0 : i32
    %74 = tpu.memref_slice %arg5[%c4_i32_50, %c0_i32_51] : memref<8x32xf32, #tpu.memory_space<vmem>> -> memref<1x32xf32, #tpu.memory_space<vmem>>
    %75 = tpu.memref_slice %arg6[%c4_i32_48] : memref<8x!tpu.dma_semaphore, #tpu.memory_space<semaphore_mem>> -> memref<1x!tpu.dma_semaphore, #tpu.memory_space<semaphore_mem>>
    %76 = tpu.memref_squeeze %75 : memref<1x!tpu.dma_semaphore, #tpu.memory_space<semaphore_mem>> -> memref<!tpu.dma_semaphore, #tpu.memory_space<semaphore_mem>>
    tpu.wait_dma2 semaphore(%76 : memref<!tpu.dma_semaphore, #tpu.memory_space<semaphore_mem>>) src(%73 : memref<1x32xf32, #tpu.memory_space<any>>) dst(%74 : memref<1x32xf32, #tpu.memory_space<vmem>>)
    %c5_i32_52 = arith.constant 5 : i32
    %c0_i32_53 = arith.constant 0 : i32
    %77 = tpu.memref_slice %arg3[%38, %c0_i32_53] : memref<10x32xf32, #tpu.memory_space<any>> -> memref<1x32xf32, #tpu.memory_space<any>>
    %c5_i32_54 = arith.constant 5 : i32
    %c0_i32_55 = arith.constant 0 : i32
    %78 = tpu.memref_slice %arg5[%c5_i32_54, %c0_i32_55] : memref<8x32xf32, #tpu.memory_space<vmem>> -> memref<1x32xf32, #tpu.memory_space<vmem>>
    %79 = tpu.memref_slice %arg6[%c5_i32_52] : memref<8x!tpu.dma_semaphore, #tpu.memory_space<semaphore_mem>> -> memref<1x!tpu.dma_semaphore, #tpu.memory_space<semaphore_mem>>
    %80 = tpu.memref_squeeze %79 : memref<1x!tpu.dma_semaphore, #tpu.memory_space<semaphore_mem>> -> memref<!tpu.dma_semaphore, #tpu.memory_space<semaphore_mem>>
    tpu.wait_dma2 semaphore(%80 : memref<!tpu.dma_semaphore, #tpu.memory_space<semaphore_mem>>) src(%77 : memref<1x32xf32, #tpu.memory_space<any>>) dst(%78 : memref<1x32xf32, #tpu.memory_space<vmem>>)
    %c6_i32_56 = arith.constant 6 : i32
    %c0_i32_57 = arith.constant 0 : i32
    %81 = tpu.memref_slice %arg3[%45, %c0_i32_57] : memref<10x32xf32, #tpu.memory_space<any>> -> memref<1x32xf32, #tpu.memory_space<any>>
    %c6_i32_58 = arith.constant 6 : i32
    %c0_i32_59 = arith.constant 0 : i32
    %82 = tpu.memref_slice %arg5[%c6_i32_58, %c0_i32_59] : memref<8x32xf32, #tpu.memory_space<vmem>> -> memref<1x32xf32, #tpu.memory_space<vmem>>
    %83 = tpu.memref_slice %arg6[%c6_i32_56] : memref<8x!tpu.dma_semaphore, #tpu.memory_space<semaphore_mem>> -> memref<1x!tpu.dma_semaphore, #tpu.memory_space<semaphore_mem>>
    %84 = tpu.memref_squeeze %83 : memref<1x!tpu.dma_semaphore, #tpu.memory_space<semaphore_mem>> -> memref<!tpu.dma_semaphore, #tpu.memory_space<semaphore_mem>>
    tpu.wait_dma2 semaphore(%84 : memref<!tpu.dma_semaphore, #tpu.memory_space<semaphore_mem>>) src(%81 : memref<1x32xf32, #tpu.memory_space<any>>) dst(%82 : memref<1x32xf32, #tpu.memory_space<vmem>>)
    %c7_i32_60 = arith.constant 7 : i32
    %c0_i32_61 = arith.constant 0 : i32
    %85 = tpu.memref_slice %arg3[%52, %c0_i32_61] : memref<10x32xf32, #tpu.memory_space<any>> -> memref<1x32xf32, #tpu.memory_space<any>>
    %c7_i32_62 = arith.constant 7 : i32
    %c0_i32_63 = arith.constant 0 : i32
    %86 = tpu.memref_slice %arg5[%c7_i32_62, %c0_i32_63] : memref<8x32xf32, #tpu.memory_space<vmem>> -> memref<1x32xf32, #tpu.memory_space<vmem>>
    %87 = tpu.memref_slice %arg6[%c7_i32_60] : memref<8x!tpu.dma_semaphore, #tpu.memory_space<semaphore_mem>> -> memref<1x!tpu.dma_semaphore, #tpu.memory_space<semaphore_mem>>
    %88 = tpu.memref_squeeze %87 : memref<1x!tpu.dma_semaphore, #tpu.memory_space<semaphore_mem>> -> memref<!tpu.dma_semaphore, #tpu.memory_space<semaphore_mem>>
    tpu.wait_dma2 semaphore(%88 : memref<!tpu.dma_semaphore, #tpu.memory_space<semaphore_mem>>) src(%85 : memref<1x32xf32, #tpu.memory_space<any>>) dst(%86 : memref<1x32xf32, #tpu.memory_space<vmem>>)
    %c0_i32_64 = arith.constant 0 : i32
    %89 = arith.cmpi eq, %arg0, %c0_i32_64 : i32
    %90 = arith.extui %89 : i1 to i32
    %c0_i32_65 = arith.constant 0 : i32
    %91 = arith.cmpi ne, %90, %c0_i32_65 : i32
    scf.if %91 {
      %cst_81 = arith.constant 0.000000e+00 : f32
      %122 = vector.broadcast %cst_81 : f32 to vector<1x1xf32>
      %c0_82 = arith.constant 0 : index
      %c0_83 = arith.constant 0 : index
      %123 = vector.load %arg4[%c0_82, %c0_83] : memref<1x1xf32, #tpu.memory_space<vmem>>, vector<1x1xf32>
      tpu.vector_store %arg4[%c0_82, %c0_83], %122 {strides = array<i32>} : memref<1x1xf32, #tpu.memory_space<vmem>>, vector<1x1xf32>,
    } else {
    }
    %c0 = arith.constant 0 : index
    %c0_66 = arith.constant 0 : index
    %92 = vector.load %arg2[%c0, %c0_66] : memref<8x32xf32, #tpu.memory_space<vmem>>, vector<8x32xf32>
    %c0_67 = arith.constant 0 : index
    %c0_68 = arith.constant 0 : index
    %93 = vector.load %arg5[%c0_67, %c0_68] : memref<8x32xf32, #tpu.memory_space<vmem>>, vector<8x32xf32>
    %94 = arith.mulf %92, %92 : vector<8x32xf32>
    %cst = arith.constant dense<0.000000e+00> : vector<8xf32>
    %95 = vector.multi_reduction <add>, %94, %cst [1] : vector<8x32xf32> to vector<8xf32>
    %96 = vector.shape_cast %95 : vector<8xf32> to vector<8x1xf32>
    %97 = arith.mulf %93, %93 : vector<8x32xf32>
    %cst_69 = arith.constant dense<0.000000e+00> : vector<8xf32>
    %98 = vector.multi_reduction <add>, %97, %cst_69 [1] : vector<8x32xf32> to vector<8xf32>
    %99 = vector.shape_cast %98 : vector<8xf32> to vector<8x1xf32>
    %100 = arith.mulf %92, %93 : vector<8x32xf32>
    %cst_70 = arith.constant dense<0.000000e+00> : vector<8xf32>
    %101 = vector.multi_reduction <add>, %100, %cst_70 [1] : vector<8x32xf32> to vector<8xf32>
    %102 = vector.shape_cast %101 : vector<8xf32> to vector<8x1xf32>
    %103 = arith.addf %96, %99 : vector<8x1xf32>
    %cst_71 = arith.constant 2.000000e+00 : f32
    %104 = vector.broadcast %cst_71 : f32 to vector<8x1xf32>
    %105 = arith.mulf %104, %102 : vector<8x1xf32>
    %106 = arith.subf %103, %105 : vector<8x1xf32>
    %cst_72 = arith.constant 9.99999996E-13 : f32
    %cst_73 = arith.constant 9.99999995E+11 : f32
    %107 = vector.broadcast %cst_72 : f32 to vector<8x1xf32>
    %108 = arith.maximumf %107, %106 : vector<8x1xf32>
    %109 = vector.broadcast %cst_73 : f32 to vector<8x1xf32>
    %110 = arith.minimumf %109, %108 : vector<8x1xf32>
    %111 = vector.shape_cast %110 : vector<8x1xf32> to vector<1x8x1xf32>
    %cst_74 = arith.constant dense<0.000000e+00> : vector<1xf32>
    %112 = vector.multi_reduction <add>, %111, %cst_74 [1, 2] : vector<1x8x1xf32> to vector<1xf32>
    %113 = vector.shape_cast %112 : vector<1xf32> to vector<1x1x1xf32>
    %114 = vector.extract %113[0, 0, 0] : f32 from vector<1x1x1xf32>
    %115 = vector.broadcast %114 : f32 to vector<1x1xf32>
    %c0_75 = arith.constant 0 : index
    %c0_76 = arith.constant 0 : index
    %116 = vector.load %arg4[%c0_75, %c0_76] : memref<1x1xf32, #tpu.memory_space<vmem>>, vector<1x1xf32>
    %117 = arith.addf %116, %115 : vector<1x1xf32>
    %c0_77 = arith.constant 0 : index
    %c0_78 = arith.constant 0 : index
    %118 = vector.load %arg4[%c0_77, %c0_78] : memref<1x1xf32, #tpu.memory_space<vmem>>, vector<1x1xf32>
    tpu.vector_store %arg4[%c0_77, %c0_78], %117 {strides = array<i32>} : memref<1x1xf32, #tpu.memory_space<vmem>>, vector<1x1xf32>,
    %c0_i32_79 = arith.constant 0 : i32
    %119 = arith.cmpi eq, %arg0, %c0_i32_79 : i32
    %120 = arith.extui %119 : i1 to i32
    %c0_i32_80 = arith.constant 0 : i32
    %121 = arith.cmpi ne, %120, %c0_i32_80 : i32
    scf.if %121 {
      %c0_81 = arith.constant 0 : index
      %c0_82 = arith.constant 0 : index
      %122 = vector.load %arg4[%c0_81, %c0_82] : memref<1x1xf32, #tpu.memory_space<vmem>>, vector<1x1xf32>
      %cst_83 = arith.constant 8.000000e+00 : f32
      %123 = vector.broadcast %cst_83 : f32 to vector<1x1xf32>
      %124 = arith.divf %122, %123 : vector<1x1xf32>
      %cst_84 = arith.constant 9.000000e-12 : f32
      %125 = vector.broadcast %cst_84 : f32 to vector<1x1xf32>
      %126 = arith.addf %124, %125 : vector<1x1xf32>
      %c0_85 = arith.constant 0 : index
      %c0_86 = arith.constant 0 : index
      %127 = vector.load %arg4[%c0_85, %c0_86] : memref<1x1xf32, #tpu.memory_space<vmem>>, vector<1x1xf32>
      tpu.vector_store %arg4[%c0_85, %c0_86], %126 {strides = array<i32>} : memref<1x1xf32, #tpu.memory_space<vmem>>, vector<1x1xf32>,
    } else {
    }
    return
  }
  func.func @transform_0(%arg0: i32, %arg1: memref<8xi32, #tpu.memory_space<smem>>) -> (i32, i32) {
    %c0_i32 = arith.constant 0 : i32
    %c0_i32_0 = arith.constant 0 : i32
    return %arg0, %c0_i32 : i32, i32
  }
  func.func @transform_2(%arg0: i32, %arg1: memref<8xi32, #tpu.memory_space<smem>>) -> (i32, i32) {
    %c0_i32 = arith.constant 0 : i32
    %c0_i32_0 = arith.constant 0 : i32
    %c0_i32_1 = arith.constant 0 : i32
    return %c0_i32, %c0_i32_0 : i32, i32
  }
}

</mosaic_0001>

<bundles_post_ra>
// kernel: tpu_custom_call.1
= control target key start
LH: loop header
LB: loop body
LE: loop exit
PB: predicated region body
PF: predicated region fallthrough
CT: control target
= control target key end

     0   :  { %s597_s12 = smov [#allocation5]   ;;  %s772_s0 = inlined_call_operand.hbm [shape: s32[8], index: 0, kind: input, shape index: {}]   ;;  %s773_s1 = inlined_call_operand.hbm [shape: f32[8,32], index: 1, kind: input, shape index: {}]   ;;  %s774_s2 = inlined_call_operand.hbm [shape: f32[10,32], index: 2, kind: input, shape index: {}]   ;;  %s775_s3 = inlined_call_operand.hbm [shape: f32[1,1], index: 3, kind: output, shape index: {}]  }
   0x1   :  { %9 = dma.hbm_to_smem %s772_s0, 16, %s597_s12, [#allocation4] }
   0x2   :  { %575 = dma.done.wait [#allocation4], 16 }
   0x3   :  { %576 = vsyncadd [#allocation4], 4294967280 }
   0x4   :  { %11 = sfence }
   0x5   :  { %12 = vsyncpa [#allocation7], 0 }
   0x6   :  { %13 = vsyncpa [#allocation8], 0  ;;  %s598_s15 = smov [#allocation6]  }
   0x7   :  { %s20_s16 = sshll.u32 %s598_s15, 4  ;;  %s21_s16 = int_to_ptr.vmem [resolvable:$true] %s20_s16 }
   0x8   :  { %s367_s17 = scalar_lea.vmem %s21_s16, 128  ;;  %p372_p1 = scmp.lt.s32.totalorder %s21_s16, %s21_s16 }
   0x9   :  { %p368_p0 = scmp.ne.s32.totalorder %s21_s16, %s367_s17  ;;  %p373_p2 = scmp.lt.s32.totalorder %s367_s17, %s367_s17 }
   0xb   :  { %p374_p3 = por %p373_p2, %p372_p1 }
   0xd   :  { %p375_p4 = pnand %p374_p3, %p368_p0 }
   0xf   :  { %378 = shalt.err (!%p375_p4)
}
  0x10   :  { %23 = dma.hbm_to_vmem [thread:$0]  %s773_s1, 128, %s21_s16, [#allocation7]  }
  0x11   :  { %577 = dma.done.wait [#allocation7], 128  }
  0x12   :  { %578 = vsyncadd [#allocation7], 4294967168  ;;  %s28_s0 = sld [smem:[#allocation5]]  ;;  %s599_s20 = smov [#allocation2]  }
  0x13   :  { %s38_s21 = sshll.u32 %s599_s20, 4  ;;  %s637_s22 = sld [smem:[#allocation5 + $0x1]]  ;;  %s635_s21 = int_to_ptr.vmem [resolvable:$true] %s38_s21 }
  0x14   :  { %s600_s23 = smov [#allocation2 + $0x1]   ;;  %s639_s25 = sld [smem:[#allocation5 + $0x2]] }
  0x15   :  { %s55_s24 = sshll.u32 %s600_s23, 4  ;;  %s601_s26 = smov [#allocation2 + $0x2]   ;;  %s641_s24 = int_to_ptr.vmem [resolvable:$true] %s55_s24 }
  0x16   :  { %s72_s27 = sshll.u32 %s601_s26, 4  ;;  %s643_s28 = sld [smem:[#allocation5 + $0x3]]  ;;  %s645_s27 = int_to_ptr.vmem [resolvable:$true] %s72_s27 }
  0x17   :  { %s602_s29 = smov [#allocation2 + $0x3]   ;;  %s656_s11 = scalar_lea.hbm %s774_s2, 256 }
  0x18   :  { %s314_s1 = sshll.u32 %s28_s0, 4  ;;  %s647_s30 = sshll.u32 %s602_s29, 4  ;;  %s90_s30 = int_to_ptr.vmem [resolvable:$true] %s647_s30 }
  0x19   :  { %s30_s6 = scalar_lea.hbm %s774_s2, %s314_s1  ;;  %s316_s7 = sshll.u32 %s637_s22, 4 }
  0x1a   :  { %s379_s8 = scalar_lea.hbm %s30_s6, 16  ;;  %p382_p6 = scmp.lt.s32.totalorder %s30_s6, %s774_s2 }
  0x1b   :  { %p380_p5 = scmp.ne.s32.totalorder %s30_s6, %s379_s8  ;;  %p383_p7 = scmp.lt.s32.totalorder %s656_s11, %s379_s8 }
  0x1d   :  { %p384_p8 = por %p383_p7, %p382_p6 }
  0x1f   :  { %p385_p9 = pnand %p384_p8, %p380_p5 }
  0x21   :  { %388 = shalt.err (!%p385_p9)  }
  0x22   :  { %s389_s14 = scalar_lea.vmem %s635_s21, 16  ;;  %s665_s15 = scalar_lea.vmem %s635_s21, 128 }
  0x23   :  { %p390_p10 = scmp.ne.s32.totalorder %s635_s21, %s389_s14  ;;  %p394_p11 = scmp.lt.s32.totalorder %s635_s21, %s635_s21 }
  0x24   :  { %p395_p12 = scmp.lt.s32.totalorder %s665_s15, %s389_s14 }
  0x26   :  { %p396_p13 = por %p395_p12, %p394_p11 }
  0x28   :  { %p397_p0 = pnand %p396_p13, %p390_p10 }
  0x2a   :  { %400 = shalt.err (!%p397_p0)  }
  0x2b   :  { %41 = dma.hbm_to_vmem [thread:$0]  %s30_s6, 16, %s635_s21, [#allocation3] }
  0x2c   :  { %s45_s18 = scalar_lea.hbm %s774_s2, %s316_s7  ;;  %s318_s19 = sshll.u32 %s639_s25, 4 }
  0x2d   :  { %s401_s0 = scalar_lea.hbm %s45_s18, 16  ;;  %p404_p2 = scmp.lt.s32.totalorder %s45_s18, %s774_s2 }
  0x2e   :  { %p402_p1 = scmp.ne.s32.totalorder %s45_s18, %s401_s0  ;;  %p405_p3 = scmp.lt.s32.totalorder %s656_s11, %s401_s0 }
  0x30   :  { %p406_p4 = por %p405_p3, %p404_p2 }
  0x32   :  { %p407_p5 = pnand %p406_p4, %p402_p1 }
  0x34   :  { %410 = shalt.err (!%p407_p5)  }
  0x35   :  { %s411_s23 = scalar_lea.vmem %s641_s24, 16  ;;  %p416_p7 = scmp.lt.s32.totalorder %s641_s24, %s635_s21 }
  0x36   :  { %p412_p6 = scmp.ne.s32.totalorder %s641_s24, %s411_s23  ;;  %p417_p8 = scmp.lt.s32.totalorder %s665_s15, %s411_s23 }
  0x38   :  { %p418_p9 = por %p417_p8, %p416_p7 }
  0x3a   :  { %p419_p10 = pnand %p418_p9, %p412_p6 }
  0x3c   :  { %422 = shalt.err (!%p419_p10)  }
  0x3d   :  { %58 = dma.hbm_to_vmem [thread:$0]  %s45_s18, 16, %s641_s24, [#allocation3 + $0x1] }
  0x3e   :  { %s62_s1 = scalar_lea.hbm %s774_s2, %s318_s19  ;;  %s320_s29 = sshll.u32 %s643_s28, 4 }
  0x3f   :  { %s423_s4 = scalar_lea.hbm %s62_s1, 16  ;;  %p426_p12 = scmp.lt.s32.totalorder %s62_s1, %s774_s2 }
  0x40   :  { %p424_p11 = scmp.ne.s32.totalorder %s62_s1, %s423_s4  ;;  %p427_p13 = scmp.lt.s32.totalorder %s656_s11, %s423_s4 }
  0x42   :  { %p428_p0 = por %p427_p13, %p426_p12 }
  0x44   :  { %p429_p1 = pnand %p428_p0, %p424_p11 }
  0x46   :  { %432 = shalt.err (!%p429_p1)  }
  0x47   :  { %s433_s24 = scalar_lea.vmem %s645_s27, 16  ;;  %p438_p3 = scmp.lt.s32.totalorder %s645_s27, %s635_s21 }
  0x48   :  { %p434_p2 = scmp.ne.s32.totalorder %s645_s27, %s433_s24  ;;  %p439_p4 = scmp.lt.s32.totalorder %s665_s15, %s433_s24 }
  0x4a   :  { %p440_p5 = por %p439_p4, %p438_p3 }
  0x4c   :  { %p441_p6 = pnand %p440_p5, %p434_p2 }
  0x4e   :  { %444 = shalt.err (!%p441_p6)  }
  0x4f   :  { %75 = dma.hbm_to_vmem [thread:$0]  %s62_s1, 16, %s645_s27, [#allocation3 + $0x2] }
  0x50   :  { %s79_s8 = scalar_lea.hbm %s774_s2, %s320_s29 }
  0x51   :  { %s445_s9 = scalar_lea.hbm %s79_s8, 16  ;;  %p448_p8 = scmp.lt.s32.totalorder %s79_s8, %s774_s2 }
  0x52   :  { %p446_p7 = scmp.ne.s32.totalorder %s79_s8, %s445_s9  ;;  %p449_p9 = scmp.lt.s32.totalorder %s656_s11, %s445_s9 }
  0x54   :  { %p450_p10 = por %p449_p9, %p448_p8 }
  0x56   :  { %p451_p11 = pnand %p450_p10, %p446_p7 }
  0x58   :  { %454 = shalt.err (!%p451_p11)  }
  0x59   :  { %s455_s13 = scalar_lea.vmem %s90_s30, 16  ;;  %p460_p13 = scmp.lt.s32.totalorder %s90_s30, %s635_s21 }
  0x5a   :  { %p456_p12 = scmp.ne.s32.totalorder %s90_s30, %s455_s13  ;;  %p461_p0 = scmp.lt.s32.totalorder %s665_s15, %s455_s13 }
  0x5c   :  { %p462_p1 = por %p461_p0, %p460_p13 }
  0x5e   :  { %p463_p2 = pnand %p462_p1, %p456_p12 }
  0x60   :  { %466 = shalt.err (!%p463_p2)  }
  0x61   :  { %92 = dma.hbm_to_vmem [thread:$0]  %s79_s8, 16, %s90_s30, [#allocation3 + $0x3] }
  0x62   :  { %s321_s27 = sld [smem:[#allocation5 + $0x4]]  ;;  %s603_s14 = smov [#allocation2 + $0x4]  }
  0x63   :  { %s106_s16 = sshll.u32 %s603_s14, 4  ;;  %s709_s17 = sld [smem:[#allocation5 + $0x5]]  ;;  %s107_s16 = int_to_ptr.vmem [resolvable:$true] %s106_s16 }
  0x64   :  { %s604_s18 = smov [#allocation2 + $0x5]   ;;  %s711_s0 = sld [smem:[#allocation5 + $0x6]] }
  0x65   :  { %s123_s19 = sshll.u32 %s604_s18, 4  ;;  %s605_s20 = smov [#allocation2 + $0x6]   ;;  %s713_s19 = int_to_ptr.vmem [resolvable:$true] %s123_s19 }
  0x66   :  { %s140_s22 = sshll.u32 %s605_s20, 4  ;;  %s715_s23 = sld [smem:[#allocation5 + $0x7]]  ;;  %s717_s22 = int_to_ptr.vmem [resolvable:$true] %s140_s22 }
  0x68   :  { %s322_s25 = sshll.u32 %s321_s27, 4 }
  0x69   :  { %s96_s1 = scalar_lea.hbm %s774_s2, %s322_s25  ;;  %s324_s29 = sshll.u32 %s709_s17, 4 }
  0x6a   :  { %s467_s4 = scalar_lea.hbm %s96_s1, 16  ;;  %p470_p4 = scmp.lt.s32.totalorder %s96_s1, %s774_s2 }
  0x6b   :  { %p468_p3 = scmp.ne.s32.totalorder %s96_s1, %s467_s4  ;;  %p471_p5 = scmp.lt.s32.totalorder %s656_s11, %s467_s4 }
  0x6d   :  { %p472_p6 = por %p471_p5, %p470_p4 }
  0x6f   :  { %p473_p7 = pnand %p472_p6, %p468_p3 }
  0x71   :  { %476 = shalt.err (!%p473_p7)  }
  0x72   :  { %s477_s24 = scalar_lea.vmem %s107_s16, 16  ;;  %p482_p9 = scmp.lt.s32.totalorder %s107_s16, %s635_s21 }
  0x73   :  { %p478_p8 = scmp.ne.s32.totalorder %s107_s16, %s477_s24  ;;  %p483_p10 = scmp.lt.s32.totalorder %s665_s15, %s477_s24 }
  0x75   :  { %p484_p11 = por %p483_p10, %p482_p9 }
  0x77   :  { %p485_p12 = pnand %p484_p11, %p478_p8 }
  0x79   :  { %488 = shalt.err (!%p485_p12)  }
  0x7a   :  { %109 = dma.hbm_to_vmem [thread:$0]  %s96_s1, 16, %s107_s16, [#allocation3 + $0x4] }
  0x7b   :  { %s113_s8 = scalar_lea.hbm %s774_s2, %s324_s29  ;;  %s326_s9 = sshll.u32 %s711_s0, 4 }
  0x7c   :  { %s489_s10 = scalar_lea.hbm %s113_s8, 16  ;;  %p492_p0 = scmp.lt.s32.totalorder %s113_s8, %s774_s2 }
  0x7d   :  { %p490_p13 = scmp.ne.s32.totalorder %s113_s8, %s489_s10  ;;  %p493_p1 = scmp.lt.s32.totalorder %s656_s11, %s489_s10 }
  0x7f   :  { %p494_p2 = por %p493_p1, %p492_p0 }
  0x81   :  { %p495_p3 = pnand %p494_p2, %p490_p13 }
  0x83   :  { %498 = shalt.err (!%p495_p3)  }
  0x84   :  { %s499_s27 = scalar_lea.vmem %s713_s19, 16  ;;  %p504_p5 = scmp.lt.s32.totalorder %s713_s19, %s635_s21 }
  0x85   :  { %p500_p4 = scmp.ne.s32.totalorder %s713_s19, %s499_s27  ;;  %p505_p6 = scmp.lt.s32.totalorder %s665_s15, %s499_s27 }
  0x87   :  { %p506_p7 = por %p505_p6, %p504_p5 }
  0x89   :  { %p507_p8 = pnand %p506_p7, %p500_p4 }
  0x8b   :  { %510 = shalt.err (!%p507_p8)  }
  0x8c   :  { %126 = dma.hbm_to_vmem [thread:$0]  %s113_s8, 16, %s713_s19, [#allocation3 + $0x5] }
  0x8d   :  { %s130_s17 = scalar_lea.hbm %s774_s2, %s326_s9  ;;  %s328_s18 = sshll.u32 %s715_s23, 4 }
  0x8e   :  { %s511_s0 = scalar_lea.hbm %s130_s17, 16  ;;  %p514_p10 = scmp.lt.s32.totalorder %s130_s17, %s774_s2 }
  0x8f   :  { %p512_p9 = scmp.ne.s32.totalorder %s130_s17, %s511_s0  ;;  %p515_p11 = scmp.lt.s32.totalorder %s656_s11, %s511_s0 }
  0x91   :  { %p516_p12 = por %p515_p11, %p514_p10 }
  0x93   :  { %p517_p13 = pnand %p516_p12, %p512_p9 }
  0x95   :  { %520 = shalt.err (!%p517_p13)  }
  0x96   :  { %s521_s19 = scalar_lea.vmem %s717_s22, 16  ;;  %p526_p1 = scmp.lt.s32.totalorder %s717_s22, %s635_s21 }
  0x97   :  { %p522_p0 = scmp.ne.s32.totalorder %s717_s22, %s521_s19  ;;  %p527_p2 = scmp.lt.s32.totalorder %s665_s15, %s521_s19 }
  0x99   :  { %p528_p3 = por %p527_p2, %p526_p1 }
  0x9b   :  { %p529_p4 = pnand %p528_p3, %p522_p0 }
  0x9d   :  { %532 = shalt.err (!%p529_p4)  }
  0x9e   :  { %143 = dma.hbm_to_vmem [thread:$0]  %s130_s17, 16, %s717_s22, [#allocation3 + $0x6] }
  0x9f   :  { %s147_s26 = scalar_lea.hbm %s774_s2, %s328_s18  ;;  %s606_s1 = smov [#allocation2 + $0x7]  }
  0xa0   :  { %s157_s29 = sshll.u32 %s606_s1, 4  ;;  %s533_s4 = scalar_lea.hbm %s147_s26, 16  ;;  %s158_s29 = int_to_ptr.vmem [resolvable:$true] %s157_s29 }
  0xa1   :  { %p534_p5 = scmp.ne.s32.totalorder %s147_s26, %s533_s4  ;;  %p536_p6 = scmp.lt.s32.totalorder %s147_s26, %s774_s2 }
  0xa2   :  { %p537_p7 = scmp.lt.s32.totalorder %s656_s11, %s533_s4 }
  0xa4   :  { %p538_p8 = por %p537_p7, %p536_p6 }
  0xa6   :  { %p539_p9 = pnand %p538_p8, %p534_p5 }
  0xa8   :  { %542 = shalt.err (!%p539_p9)  }
  0xa9   :  { %s543_s24 = scalar_lea.vmem %s158_s29, 16  ;;  %p548_p11 = scmp.lt.s32.totalorder %s158_s29, %s635_s21 }
  0xaa   :  { %p544_p10 = scmp.ne.s32.totalorder %s158_s29, %s543_s24  ;;  %p549_p12 = scmp.lt.s32.totalorder %s665_s15, %s543_s24 }
  0xac   :  { %p550_p13 = por %p549_p12, %p548_p11 }
  0xae   :  { %p551_p0 = pnand %p550_p13, %p544_p10 }
  0xb0   :  { %554 = shalt.err (!%p551_p0)  }
  0xb1   :  { %160 = dma.hbm_to_vmem [thread:$0]  %s147_s26, 16, %s158_s29, [#allocation3 + $0x7] }
  0xb2   :  { %579 = dma.done.wait [#allocation3], 16 }
  0xb3   :  { %580 = vsyncadd [#allocation3], 4294967280 }
  0xb4   :  { %581 = dma.done.wait [#allocation3 + $0x1], 16 }
  0xb5   :  { %582 = vsyncadd [#allocation3 + $0x1], 4294967280 }
  0xb6   :  { %583 = dma.done.wait [#allocation3 + $0x2], 16 }
  0xb7   :  { %584 = vsyncadd [#allocation3 + $0x2], 4294967280 }
  0xb8   :  { %585 = dma.done.wait [#allocation3 + $0x3], 16 }
  0xb9   :  { %586 = vsyncadd [#allocation3 + $0x3], 4294967280 }
  0xba   :  { %587 = dma.done.wait [#allocation3 + $0x4], 16 }
  0xbb   :  { %588 = vsyncadd [#allocation3 + $0x4], 4294967280 }
  0xbc   :  { %589 = dma.done.wait [#allocation3 + $0x5], 16 }
  0xbd   :  { %590 = vsyncadd [#allocation3 + $0x5], 4294967280 }
  0xbe   :  { %591 = dma.done.wait [#allocation3 + $0x6], 16 }
  0xbf   :  { %592 = vsyncadd [#allocation3 + $0x6], 4294967280 }
  0xc0   :  { %593 = dma.done.wait [#allocation3 + $0x7], 16 }
  0xc1   :  { %594 = vsyncadd [#allocation3 + $0x7], 4294967280  ;;  %v184_v0 = vld [vmem:[#allocation6] sm:$0xff]  ;;  %vm187_vm0 = vcmask 261120   ;;  %v185_v1 = vld [vmem:[#allocation2] sm:$0xff]  ;;  %vm204_vm1 = vcmask 7168  }
  0xc2   :  { %v186_v2 = vmul.f32 %v184_v0, %v184_v0  ;;  %v195_v3 = vmul.f32 %v185_v1, %v184_v0  ;;  %v191_v4 = vmul.f32 %v185_v1, %v185_v1  ;;  %vm182_vm2 = vcmask 0   ;;  %s608_s21 = smov [#allocation9]  }
  0xc3   :  { %v607_v17 = vmov 0.0   ;;  %s234_s11 = sshll.u32 %s608_s21, 4  ;;  %s235_s11 = int_to_ptr.vmem [resolvable:$true] %s234_s11 }
  0xc4   :  { %v188_v5 = vsel %vm187_vm0, %v186_v2, 0.0  ;;  %v196_v6 = vsel %vm187_vm0, %v195_v3, 0.0  ;;  %v192_v7 = vsel %vm187_vm0, %v191_v4, 0.0  ;;  %183 = vst.msk [vmem:[#allocation9] sm:$0x1] %vm182_vm2, %v607_v17  ;;  %s555_s15 = scalar_lea.vmem %s235_s11, 16  ;;  %p560_p2 = scmp.lt.s32.totalorder %s235_s11, %s235_s11 }
  0xc5   :  { %189 = vadd.xlane.f32.xlu0 %v188_v5  ;;  %197 = vadd.xlane.f32.xlu1 %v196_v6  ;;  %p556_p1 = scmp.ne.s32.totalorder %s235_s11, %s555_s15  ;;  %s559_s22 = scalar_lea.vmem %s235_s11, 32 }
  0xc6   :  { %p561_p3 = scmp.lt.s32.totalorder %s559_s22, %s555_s15 }
  0xc8   :  { %p562_p4 = por %p561_p3, %p560_p2 }
  0xc9   :  { %193 = vadd.xlane.f32.xlu0 %v192_v7 }
  0xca   :  { %p563_p5 = pnand %p562_p4, %p556_p1 }
  0xcb   :  { %v216_v25 = vld [vmem:[#allocation9] sm:$0x1] }
 0x14e   :  { %v190_v8 = vpop.xlane.xlu0 %189  ;;  %v198_v9 = vpop.xlane.xlu1 %197 }
 0x14f   :  { %v200_v10 = vmul.f32 2.0, %v198_v9 }
 0x152   :  { %v194_v11 = vpop.xlane.xlu0 %193 }
 0x153   :  { %v199_v12 = vadd.f32 %v194_v11, %v190_v8 }
 0x155   :  { %v201_v13 = vsub.f32 %v199_v12, %v200_v10 }
 0x157   :  { %v202_v14 = vmax.f32 %v201_v13, 1e-12 }
 0x159   :  { %v203_v15 = vmin.f32 %v202_v14, 1e+12 }
 0x15b   :  { %v205_v16 = vsel %vm204_vm1, %v203_v15, 0.0 }
 0x15c   :  { %206 = vadd.xlane.f32.xlu1 %v205_v16 }
 0x1e5   :  { %v207_v18 = vpop.xlane.xlu1 %206 }
 0x1e6   :  { %v208_v19 = vrot.slane %v207_v18, 4 }
 0x1e8   :  { %v209_v20 = vadd.f32 %v208_v19, %v207_v18 }
 0x1ea   :  { %v210_v21 = vrot.slane %v209_v20, 2 }
 0x1ec   :  { %v211_v22 = vadd.f32 %v210_v21, %v209_v20 }
 0x1ee   :  { %v212_v23 = vrot.slane %v211_v22, 1 }
 0x1f0   :  { %v213_v24 = vadd.f32 %v212_v23, %v211_v22 }
 0x1f2   :  { %337 = vpush %v213_v24 }
 0x223   :  { %s338_s2 = spop %337 }
 0x224   :  { %v215_v26 = vstv %s338_s2 }
 0x225   :  { %v217_v27 = vadd.f32 %v216_v25, %v215_v26 }
 0x227   :  { %219 = vst.msk [vmem:[#allocation9] sm:$0x1] %vm182_vm2, %v217_v27 }
 0x22e   :  { %v223_v28 = vld [vmem:[#allocation9] sm:$0x1] }
 0x22f   :  { %v225_v29 = vmul.f32 0.125, %v223_v28 }
 0x231   :  { %v226_v30 = vadd.f32 9e-12, %v225_v29 }
 0x233   :  { %227 = vst.msk [vmem:[#allocation9] sm:$0x1] %vm182_vm2, %v226_v30 }
 0x234   :  { %566 = shalt.err (!%p563_p5)
}
 0x235   :  { %237 = dma.vmem_to_hbm [thread:$0]  %s235_s11, 16, %s775_s3, [#allocation8]  }
 0x236   :  { %595 = dma.done.wait [#allocation8], 16  }
 0x237   :  { %596 = vsyncadd [#allocation8], 4294967280 }
 0x238   :  { %241 = vsyncpa [#allocation7], 1 }
 0x239   :  { %242 = vsyncpa [#allocation8], 1 }
 0x23a   :  { %243 = vsyncmov [#allocation3] }
 0x23d   :  { %s244_s8 = vpop.sfrf %243 }
 0x23e   :  { %p329_p6 = scmp.ne.s32.totalorder %s244_s8, 0 }
 0x240   :  { %248 = shalt.err (%p329_p6)  }
 0x241   :  { %250 = vsyncmov [#allocation3 + $0x1] }
 0x244   :  { %s251_s9 = vpop.sfrf %250 }
 0x245   :  { %p330_p7 = scmp.ne.s32.totalorder %s251_s9, 0 }
 0x247   :  { %255 = shalt.err (%p330_p7)  }
 0x248   :  { %257 = vsyncmov [#allocation3 + $0x2] }
 0x24b   :  { %s258_s10 = vpop.sfrf %257 }
 0x24c   :  { %p331_p8 = scmp.ne.s32.totalorder %s258_s10, 0 }
 0x24e   :  { %262 = shalt.err (%p331_p8)  }
 0x24f   :  { %264 = vsyncmov [#allocation3 + $0x3] }
 0x252   :  { %s265_s12 = vpop.sfrf %264 }
 0x253   :  { %p332_p9 = scmp.ne.s32.totalorder %s265_s12, 0 }
 0x255   :  { %269 = shalt.err (%p332_p9)  }
 0x256   :  { %271 = vsyncmov [#allocation3 + $0x4] }
 0x259   :  { %s272_s3 = vpop.sfrf %271 }
 0x25a   :  { %p333_p10 = scmp.ne.s32.totalorder %s272_s3, 0 }
 0x25c   :  { %276 = shalt.err (%p333_p10)  }
 0x25d   :  { %278 = vsyncmov [#allocation3 + $0x5] }
 0x260   :  { %s279_s13 = vpop.sfrf %278 }
 0x261   :  { %p334_p11 = scmp.ne.s32.totalorder %s279_s13, 0 }
 0x263   :  { %283 = shalt.err (%p334_p11)  }
 0x264   :  { %285 = vsyncmov [#allocation3 + $0x6] }
 0x267   :  { %s286_s27 = vpop.sfrf %285 }
 0x268   :  { %p335_p12 = scmp.ne.s32.totalorder %s286_s27, 0 }
 0x26a   :  { %290 = shalt.err (%p335_p12)  }
 0x26b   :  { %292 = vsyncmov [#allocation3 + $0x7] }
 0x26e   :  { %s293_s14 = vpop.sfrf %292 }
 0x26f   :  { %p336_p13 = scmp.ne.s32.totalorder %s293_s14, 0 }
 0x271   :  { %297 = shalt.err (%p336_p13)  }

</bundles_post_ra>
